<compile_context>
chip_gen: v7x
topology: tpu7x:2x2x1
jax: 0.10.0
libtpu: 0.0.40
codegen_flags: <defaults>
</compile_context>

<pallas_src>
import functools

import jax
import jax.numpy as jnp
from jax.experimental import pallas as pl
from jax.experimental.pallas import tpu as pltpu

EPS = 1e-5


def _pick_tile_m(m):
    """Largest row tile <= 1024 that divides m and leaves >= 2 grid steps."""
    for t in (1024, 512, 256, 128, 64, 32, 16, 8):
        if m % t == 0 and m // t >= 2:
            return t
    return m


# ----------------------------- Stage A kernel --------------------------------
# BN1 (precomputed scale/shift) -> ReLU -> 1x1 conv (matmul), plus per-tile
# partial sums for the BN2 batch statistics.
def _bn_relu_conv1_kernel(x_ref, w1_ref, s1_ref, t1_ref, y_ref, st_ref):
    x = x_ref[...]                                          # (TM, Cin) f32
    h = jnp.maximum(x * s1_ref[...] + t1_ref[...], 0.0)     # BN1 + ReLU
    y = jnp.dot(h, w1_ref[...], preferred_element_type=jnp.float32)
    y_ref[...] = y
    s = jnp.sum(y, axis=0, keepdims=True)                   # (1, C4)
    ss = jnp.sum(y * y, axis=0, keepdims=True)               # (1, C4)
    st_ref[0] = jnp.concatenate([s, ss], axis=0)             # (2, C4)


# ----------------------------- Stage B kernel --------------------------------
# BN2 (precomputed scale/shift) -> 3x3 conv (single im2col matmul, padding
# handled via zeroed VMEM scratch) -> ReLU -> concat([conv_out, x], channels).
def _bn2_conv3_relu_cat_kernel(y_ref, x_ref, w2_ref, s2_ref, t2_ref, o_ref,
                               buf_ref, *, h, w, c4, pad):
    hw = h * w
    y = y_ref[0]                                            # (HW, C4)
    ybn = y * s2_ref[...] + t2_ref[...]                     # BN2

    # Zero-padded flat buffer in VMEM: buf[pad + m] = ybn[m], zeros elsewhere.
    buf_ref[...] = jnp.zeros((hw + 2 * pad, c4), jnp.float32)
    buf_ref[pad:pad + hw, :] = ybn

    # Column index of every flattened pixel (for the W-border mask).
    col_idx = jax.lax.broadcasted_iota(jnp.int32, (hw, 1), 0) % w

    taps = []
    for ki in range(3):
        for kj in range(3):
            off = (ki - 1) * w + (kj - 1)
            sl = buf_ref[pad + off:pad + off + hw, :]       # flat row shift
            if kj != 1:                                     # W-border zeroing
                wj = col_idx + (kj - 1)
                valid = jnp.logical_and(wj >= 0, wj < w)
                sl = jnp.where(valid, sl, 0.0)
            taps.append(sl)
    col = jnp.concatenate(taps, axis=1)                     # (HW, 9*C4)
    conv = jnp.dot(col, w2_ref[...], preferred_element_type=jnp.float32)
    out = jnp.maximum(conv, 0.0)                            # ReLU
    o_ref[0] = jnp.concatenate([out, x_ref[0]], axis=1)     # fused torch.cat


# -------------------------------- Wrapper -------------------------------------
def bottleneck_forward(x_nchw, w1_oihw, g1, b1, g2, b2, w2_oihw):
    n, cin, hh, ww = x_nchw.shape
    c4 = w1_oihw.shape[0]
    cg = w2_oihw.shape[0]
    hw = hh * ww
    m = n * hw
    cout = cg + cin

    x_nhwc = jnp.transpose(x_nchw, (0, 2, 3, 1)).astype(jnp.float32)
    x2d = x_nhwc.reshape(m, cin)

    # torch conv1 weight (C4, Cin, 1, 1) -> (Cin, C4)
    w1 = jnp.transpose(w1_oihw[:, :, 0, 0], (1, 0))
    # torch conv2 weight (Cg, C4, 3, 3) -> (9*C4, Cg), tap-major (ki, kj, c).
    w2 = jnp.transpose(w2_oihw, (2, 3, 1, 0)).reshape(9 * c4, cg)

    # BN1 batch statistics (biased variance) hoisted out of the tiled kernel.
    mean1 = jnp.mean(x2d, axis=0)
    var1 = jnp.mean(jnp.square(x2d - mean1), axis=0)
    s1 = g1 * jax.lax.rsqrt(var1 + EPS)
    t1 = b1 - mean1 * s1

    tm = _pick_tile_m(m)
    gm = m // tm

    y2d, stats = pl.pallas_call(
        _bn_relu_conv1_kernel,
        grid=(gm,),
        in_specs=[
            pl.BlockSpec((tm, cin), lambda i: (i, 0)),
            pl.BlockSpec((cin, c4), lambda i: (0, 0)),
            pl.BlockSpec((1, cin), lambda i: (0, 0)),
            pl.BlockSpec((1, cin), lambda i: (0, 0)),
        ],
        out_specs=[
            pl.BlockSpec((tm, c4), lambda i: (i, 0)),
            pl.BlockSpec((1, 2, c4), lambda i: (i, 0, 0)),
        ],
        out_shape=[
            jax.ShapeDtypeStruct((m, c4), jnp.float32),
            jax.ShapeDtypeStruct((gm, 2, c4), jnp.float32),
        ],
        compiler_params=pltpu.CompilerParams(
            dimension_semantics=("parallel",)),
    )(x2d, w1, s1[None, :], t1[None, :])

    # BN2 batch statistics from the per-tile partial sums (tiny reduction).
    sum_y = jnp.sum(stats[:, 0, :], axis=0)
    sum_y2 = jnp.sum(stats[:, 1, :], axis=0)
    mean2 = sum_y / m
    var2 = jnp.maximum(sum_y2 / m - jnp.square(mean2), 0.0)   # biased variance
    s2 = g2 * jax.lax.rsqrt(var2 + EPS)
    t2 = b2 - mean2 * s2

    y3 = y2d.reshape(n, hw, c4)
    x3 = x_nhwc.reshape(n, hw, cin)
    pad = ((ww + 1 + 7) // 8) * 8                             # halo, 8-aligned

    out3 = pl.pallas_call(
        functools.partial(_bn2_conv3_relu_cat_kernel,
                          h=hh, w=ww, c4=c4, pad=pad),
        grid=(n,),
        in_specs=[
            pl.BlockSpec((1, hw, c4), lambda i: (i, 0, 0)),
            pl.BlockSpec((1, hw, cin), lambda i: (i, 0, 0)),
            pl.BlockSpec((9 * c4, cg), lambda i: (0, 0)),
            pl.BlockSpec((1, c4), lambda i: (0, 0)),
            pl.BlockSpec((1, c4), lambda i: (0, 0)),
        ],
        out_specs=pl.BlockSpec((1, hw, cout), lambda i: (i, 0, 0)),
        out_shape=jax.ShapeDtypeStruct((n, hw, cout), jnp.float32),
        scratch_shapes=[pltpu.VMEM((hw + 2 * pad, c4), jnp.float32)],
        compiler_params=pltpu.CompilerParams(
            dimension_semantics=("parallel",)),
    )(y3, x3, w2, s2[None, :], t2[None, :])

    out_nhwc = out3.reshape(n, hh, ww, cout)
    return jnp.transpose(out_nhwc, (0, 3, 1, 2))              # back to NCHW


# --------------------------- Pure-JAX reference --------------------------------
def bottleneck_ref(x, w1_oihw, g1, b1, g2, b2, w2_oihw):
    def bn(v, g, b):
        mean = jnp.mean(v, axis=(0, 2, 3), keepdims=True)
        var = jnp.mean((v - mean) ** 2, axis=(0, 2, 3), keepdims=True)
        return ((v - mean) * jax.lax.rsqrt(var + EPS)
                * g.reshape(1, -1, 1, 1) + b.reshape(1, -1, 1, 1))

    dn = ("NCHW", "OIHW", "NCHW")
    h = jax.nn.relu(bn(x, g1, b1))
    y = jax.lax.conv_general_dilated(h, w1_oihw, (1, 1), "VALID",
                                     dimension_numbers=dn)
    y = bn(y, g2, b2)
    z = jax.lax.conv_general_dilated(y, w2_oihw, (1, 1),
                                     ((1, 1), (1, 1)), dimension_numbers=dn)
    z = jax.nn.relu(z)
    return jnp.concatenate([z, x], axis=1)


if __name__ == "__main__":
    in_planes, growth_rate = 4, 4
    c4, cg = 4 * growth_rate, growth_rate
    N, H, W = 2, 16, 16

    key = jax.random.PRNGKey(0)
    k = jax.random.split(key, 7)
    x = jax.random.normal(k[0], (N, in_planes, H, W), jnp.float32)
    w1 = 0.1 * jax.random.normal(k[1], (c4, in_planes, 1, 1), jnp.float32)
    w2 = 0.1 * jax.random.normal(k[2], (cg, c4, 3, 3), jnp.float32)
    g1 = 1.0 + 0.1 * jax.random.normal(k[3], (in_planes,), jnp.float32)
    b1 = 0.1 * jax.random.normal(k[4], (in_planes,), jnp.float32)
    g2 = 1.0 + 0.1 * jax.random.normal(k[5], (c4,), jnp.float32)
    b2 = 0.1 * jax.random.normal(k[6], (c4,), jnp.float32)

    out = bottleneck_forward(x, w1, g1, b1, g2, b2, w2)
    out = jax.block_until_ready(out)

    ref = bottleneck_ref(x, w1, g1, b1, g2, b2, w2)
    assert out.shape == (N, cg + in_planes, H, W), out.shape
    assert jnp.allclose(out, ref, atol=2e-3, rtol=2e-3), \
        float(jnp.max(jnp.abs(out - ref)))

    # TODO(synk): BatchNorm running-stat buffer updates are stateful training
    # bookkeeping and do not affect the forward output, so they are omitted.
    print("KERNEL_OK")
</pallas_src>

<mosaic_0001>
module attributes {stable_mosaic.version = 11 : i64} {
  func.func @_bn_relu_conv1_kernel(%arg0: i32, %arg1: memref<256x4xf32, #tpu.memory_space<vmem>>, %arg2: memref<4x16xf32, #tpu.memory_space<vmem>>, %arg3: memref<1x4xf32, #tpu.memory_space<vmem>>, %arg4: memref<1x4xf32, #tpu.memory_space<vmem>>, %arg5: memref<256x16xf32, #tpu.memory_space<vmem>>, %arg6: memref<1x2x16xf32, #tpu.memory_space<vmem>>) attributes {dimension_semantics = [#tpu.dimension_semantics<parallel>], iteration_bounds = array<i64: 2>, scalar_prefetch = 0 : i64, scratch_operands = 0 : i64, tpu.core_type = #tpu.core_type<tc>, window_params = [{transform_indices = @transform_0, window_bounds = array<i64: 256, 4>}, {pipeline_mode = #tpu.pipeline_mode<synchronous>, transform_indices = @transform_1, window_bounds = array<i64: 4, 16>}, {pipeline_mode = #tpu.pipeline_mode<synchronous>, transform_indices = @transform_2, window_bounds = array<i64: 1, 4>}, {pipeline_mode = #tpu.pipeline_mode<synchronous>, transform_indices = @transform_3, window_bounds = array<i64: 1, 4>}, {transform_indices = @transform_4, window_bounds = array<i64: 256, 16>}, {transform_indices = @transform_5, window_bounds = array<i64: 1, 2, 16>}]} {
    %c0 = arith.constant 0 : index
    %c0_0 = arith.constant 0 : index
    %0 = vector.load %arg1[%c0, %c0_0] : memref<256x4xf32, #tpu.memory_space<vmem>>, vector<256x4xf32>
    %c0_1 = arith.constant 0 : index
    %c0_2 = arith.constant 0 : index
    %1 = vector.load %arg3[%c0_1, %c0_2] : memref<1x4xf32, #tpu.memory_space<vmem>>, vector<1x4xf32>
    %2 = vector.broadcast %1 : vector<1x4xf32> to vector<256x4xf32>
    %3 = arith.mulf %0, %2 : vector<256x4xf32>
    %c0_3 = arith.constant 0 : index
    %c0_4 = arith.constant 0 : index
    %4 = vector.load %arg4[%c0_3, %c0_4] : memref<1x4xf32, #tpu.memory_space<vmem>>, vector<1x4xf32>
    %5 = vector.broadcast %4 : vector<1x4xf32> to vector<256x4xf32>
    %6 = arith.addf %3, %5 : vector<256x4xf32>
    %cst = arith.constant 0.000000e+00 : f32
    %7 = vector.broadcast %cst : f32 to vector<256x4xf32>
    %8 = arith.maximumf %6, %7 : vector<256x4xf32>
    %c0_5 = arith.constant 0 : index
    %c0_6 = arith.constant 0 : index
    %9 = vector.load %arg2[%c0_5, %c0_6] : memref<4x16xf32, #tpu.memory_space<vmem>>, vector<4x16xf32>
    %cst_7 = arith.constant dense<0.000000e+00> : vector<256x16xf32>
    %10 = tpu.matmul %8, %9, %cst_7 {dimension_numbers = #tpu.dot_dimension_numbers<[1], [0], [0], [1], [0, 0, 1, 1], [], []>} : vector<256x4xf32>, vector<4x16xf32>, vector<256x16xf32> -> vector<256x16xf32>
    %c0_8 = arith.constant 0 : index
    %c0_9 = arith.constant 0 : index
    %11 = vector.load %arg5[%c0_8, %c0_9] : memref<256x16xf32, #tpu.memory_space<vmem>>, vector<256x16xf32>
    tpu.vector_store %arg5[%c0_8, %c0_9], %10 {strides = array<i32>} : memref<256x16xf32, #tpu.memory_space<vmem>>, vector<256x16xf32>,
    %cst_10 = arith.constant dense<0.000000e+00> : vector<16xf32>
    %12 = vector.multi_reduction <add>, %10, %cst_10 [0] : vector<256x16xf32> to vector<16xf32>
    %13 = vector.shape_cast %12 : vector<16xf32> to vector<1x16xf32>
    %14 = arith.mulf %10, %10 : vector<256x16xf32>
    %cst_11 = arith.constant dense<0.000000e+00> : vector<16xf32>
    %15 = vector.multi_reduction <add>, %14, %cst_11 [0] : vector<256x16xf32> to vector<16xf32>
    %16 = vector.shape_cast %15 : vector<16xf32> to vector<1x16xf32>
    %17 = tpu.concatenate %13, %16 in 0 : vector<1x16xf32>, vector<1x16xf32> -> vector<2x16xf32>
    %c0_12 = arith.constant 0 : index
    %c0_13 = arith.constant 0 : index
    %c0_14 = arith.constant 0 : index
    %18 = vector.load %arg6[%c0_12, %c0_13, %c0_14] : memref<1x2x16xf32, #tpu.memory_space<vmem>>, vector<1x2x16xf32>
    %19 = vector.shape_cast %18 : vector<1x2x16xf32> to vector<2x16xf32>
    %20 = vector.shape_cast %17 : vector<2x16xf32> to vector<1x2x16xf32>
    tpu.vector_store %arg6[%c0_12, %c0_13, %c0_14], %20 {strides = array<i32>} : memref<1x2x16xf32, #tpu.memory_space<vmem>>, vector<1x2x16xf32>,
    return
  }
  func.func @transform_0(%arg0: i32) -> (i32, i32) {
    %c0_i32 = arith.constant 0 : i32
    %c0_i32_0 = arith.constant 0 : i32
    return %arg0, %c0_i32 : i32, i32
  }
  func.func @transform_1(%arg0: i32) -> (i32, i32) {
    %c0_i32 = arith.constant 0 : i32
    %c0_i32_0 = arith.constant 0 : i32
    %c0_i32_1 = arith.constant 0 : i32
    return %c0_i32, %c0_i32_0 : i32, i32
  }
  func.func @transform_2(%arg0: i32) -> (i32, i32) {
    %c0_i32 = arith.constant 0 : i32
    %c0_i32_0 = arith.constant 0 : i32
    %c0_i32_1 = arith.constant 0 : i32
    return %c0_i32, %c0_i32_0 : i32, i32
  }
  func.func @transform_3(%arg0: i32) -> (i32, i32) {
    %c0_i32 = arith.constant 0 : i32
    %c0_i32_0 = arith.constant 0 : i32
    %c0_i32_1 = arith.constant 0 : i32
    return %c0_i32, %c0_i32_0 : i32, i32
  }
  func.func @transform_4(%arg0: i32) -> (i32, i32) {
    %c0_i32 = arith.constant 0 : i32
    %c0_i32_0 = arith.constant 0 : i32
    return %arg0, %c0_i32 : i32, i32
  }
  func.func @transform_5(%arg0: i32) -> (i32, i32, i32) {
    %c0_i32 = arith.constant 0 : i32
    %c0_i32_0 = arith.constant 0 : i32
    %c0_i32_1 = arith.constant 0 : i32
    return %arg0, %c0_i32, %c0_i32_0 : i32, i32, i32
  }
}

</mosaic_0001>

<bundles_post_ra>
// kernel: tpu_custom_call.1
= control target key start
LH: loop header
LB: loop body
LE: loop exit
PB: predicated region body
PF: predicated region fallthrough
CT: control target
= control target key end

     0   :  { %11 = vsyncpa [#allocation3], 0  ;;  %s1743_s0 = inlined_call_operand.vmem [shape: f32[512,4], index: 0, kind: input, shape index: {}]   ;;  %s1744_s1 = inlined_call_operand.vmem [shape: f32[4,16], index: 1, kind: input, shape index: {}]   ;;  %s1745_s2 = inlined_call_operand.vmem [shape: f32[1,4], index: 2, kind: input, shape index: {}]   ;;  %s1746_s3 = inlined_call_operand.vmem [shape: f32[1,4], index: 3, kind: input, shape index: {}]   ;;  %s1747_s4 = inlined_call_operand.vmem [shape: f32[512,16], index: 4, kind: output, shape index: {0}]   ;;  %s1748_s5 = inlined_call_operand.hbm [shape: f32[2,2,16], index: 5, kind: output, shape index: {1}]  }
   0x1   :  { %13 = vsyncpa [#allocation3 + $0x1], 0  ;;  %s1289_s18 = smov 0   ;;  %s1291_s19 = smov 0  }
   0x2   :  { %s1293_s20 = smov 0   ;;  %s1295_s21 = smov 0  }
   0x3 LB: > { %s1021_s22 = sadd.s32 4294967295, %s1256_s21   ;;  %s1022_s23 = sadd.s32 4294967294, %s1256_s21   ;;  %s1256_s21 = sphi %s1295_s21, %s1754_s21   ;;  %s1252_s20 = sphi %s1293_s20, %s1753_s20   ;;  %s1248_s19 = sphi %s1291_s19, %s1752_s19   ;;  %s1244_s18 = sphi %s1289_s18, %s1751_s18  }
   0x4   : > { %s1312_s24 = sadd.s32 1, %s1256_s21   ;;  %s141_s25 = sadd.s32 1, %s1252_s20 }
   0x5   : > { %s138_s26 = ssub.s32 %s1256_s21, %s1312_s24  ;;  %p151_p0 = scmp.ne.s32.totalorder %s1252_s20, %s1248_s19 }
   0x6   : > { %p139_p1 = scmp.eq.s32.totalorder %s138_s26, 0  ;;  %p152_p2 = scmp.eq.s32.totalorder %s1021_s22, 1 }
   0x7   : > { %p157_p3 = scmp.ne.s32.totalorder %s1248_s19, %s1244_s18  ;;  %p158_p4 = scmp.eq.s32.totalorder %s1022_s23, 1 }
   0x8   : > { %s1322_s27 = scalar_select %p139_p1, %s1252_s20, %s141_s25  }
   0x9   : > { %p1324_p5 = por %p152_p2, %p151_p0  ;;  %p1328_p6 = por %p158_p4, %p157_p3 }
   0xa   : > { %p1025_p7 = scmp.ge.s32.totalorder %s1256_s21, 1  ;;  %p194_p8 = scmp.lt.s32.totalorder %s1256_s21, 3 }
   0xc   : > { %p195_p9 = pnand %p1025_p7, %p194_p8 }
   0xd   : > { %v381_v0 = vld [vmem:[%s1744_s1] sm:$0xf] (!%p195_p9)  ;;  %vm479_vm0 = vcmask (!%p195_p9), 1043456   ;;  %s1337_s7 = sshll.u32 (!%p195_p9), %s1021_s22, 5  ;;  %vm382_vm1 = vcmask (!%p195_p9), 31744   ;;  %vm708_vm2 = vcmask (!%p195_p9), 130048  }
   0xe   : > { %198 = sbr.rel (%p195_p9) target bundleno = 340 (0x154), region = 36  ;;  %1103 = vmatprep.subr.msk.mxu0 (!%p195_p9), %vm479_vm0, %v381_v0  ;;  %p228_p10 = scmp.lt.s32.totalorder (!%p195_p9), %s1337_s7, 63  ;;  %1153 = vmatprep.subr.msk.mxu1 (!%p195_p9), %vm479_vm0, %v381_v0  ;;  %v1347_v1 = vld [vmem:[%s1745_s2] ss:$0 sm:$0xff] (!%p195_p9)  ;;  %vm911_vm3 = vcmask (!%p195_p9), 1040384   ;;  %vm913_vm4 = vcmask (!%p195_p9), 123904  }
   0xf   : > { %1104 = vmatpush3.msk.msra.mxu0 (!%p195_p9), %vm479_vm0, %v381_v0  ;;  %1154 = vmatpush3.msk.msra.mxu1 (!%p195_p9), %vm479_vm0, %v381_v0  ;;  %v1359_v2 = vld [vmem:[%s1746_s3] ss:$0 sm:$0xff] (!%p195_p9)  ;;  %s224_s25 = sand.u32 (!%p195_p9), 1, %s1248_s19   ;;  %s1701_s10 = scalar_lea.hbm (!%p195_p9), %s1748_s5, %s1337_s7 }
  0x10   : > { %s1026_s26 = sshll.u32 (!%p195_p9), %s224_s25, 1  ;;  %s921_s11 = scalar_lea.sflag (!%p195_p9), [#allocation3], %s224_s25 }
  0x11   : > { %s226_s30 = scalar_lea.vmem (!%p195_p9), [#allocation2], %s1026_s26  ;;  %s1258_s13 = smov (!%p195_p9), [#allocation2]  }
  0x12   : > { %s938_s6 = sshll.u32 (!%p195_p9), %s226_s30, 4  ;;  %s1703_s6 = int_to_ptr.vmem [resolvable:$true] %s938_s6 }
  0x13   : > { %s1194_s12 = scalar_lea.vmem (!%p195_p9), %s1703_s6, 32 }
  0x14   : > { %p1195_p11 = scmp.ne.s32.totalorder (!%p195_p9), %s1703_s6, %s1194_s12 }
  0x15   : > { %s1341_s8 = scalar_select %p228_p10, %s1337_s7, 63 }
  0x16   : > { %p1196_p12 = pnand %p1195_p11, %p1324_p5 }
  0x17   : > { %s1028_s9 = sshll.u32 %s1341_s8, 3 }
  0x18   : > { %s1354_s14 = scalar_lea.vmem %s1743_s0, %s1028_s9  ;;  %s1494_s23 = scalar_lea.vmem %s1747_s4, %s1028_s9 }
  0x19   : > { %v239_v3 = vld [vmem:[%s1354_s14] sm:$0xff]  ;;  %v240_v4 = vld [vmem:[%s1354_s14 + $0x8] sm:$0xff]  ;;  %v241_v5 = vld [vmem:[%s1354_s14 + $0x10] sm:$0xff]  ;;  %p1197_p13 = pneg %p1196_p12 }
  0x1a   : > { %v278_v6 = vmul.f32 %v1347_v1, %v239_v3  ;;  %v279_v7 = vmul.f32 %v1347_v1, %v240_v4  ;;  %v280_v8 = vmul.f32 %v1347_v1, %v241_v5  ;;  %v242_v9 = vld [vmem:[%s1354_s14 + $0x18] sm:$0xff]  ;;  %v243_v10 = vld [vmem:[%s1354_s14 + $0x20] sm:$0xff]  ;;  %v244_v11 = vld [vmem:[%s1354_s14 + $0x28] sm:$0xff] }
  0x1b   : > { %v281_v12 = vmul.f32 %v1347_v1, %v242_v9  ;;  %v282_v13 = vmul.f32 %v1347_v1, %v243_v10  ;;  %v245_v14 = vld [vmem:[%s1354_s14 + $0x30] sm:$0xff]  ;;  %v246_v15 = vld [vmem:[%s1354_s14 + $0x38] sm:$0xff]  ;;  %v283_v19 = vmul.f32 %v1347_v1, %v244_v11  ;;  %v247_v27 = vld [vmem:[%s1354_s14 + $0x40] sm:$0xff] }
  0x1c   : > { %v317_v16 = vadd.f32 %v1359_v2, %v278_v6  ;;  %v318_v17 = vadd.f32 %v1359_v2, %v279_v7  ;;  %v319_v18 = vadd.f32 %v1359_v2, %v280_v8  ;;  %v284_v21 = vmul.f32 %v1347_v1, %v245_v14  ;;  %v248_v29 = vld [vmem:[%s1354_s14 + $0x48] sm:$0xff]  ;;  %v249_v34 = vld [vmem:[%s1354_s14 + $0x50] sm:$0xff]  ;;  %v250_v36 = vld [vmem:[%s1354_s14 + $0x58] sm:$0xff] }
  0x1d   : > { %v320_v20 = vadd.f32 %v1359_v2, %v281_v12  ;;  %v285_v22 = vmul.f32 %v1347_v1, %v246_v15  ;;  %v321_v26 = vadd.f32 %v1359_v2, %v282_v13  ;;  %v322_v28 = vadd.f32 %v1359_v2, %v283_v19  ;;  %v255_v38 = vld [vmem:[%s1354_s14 + $0x80] sm:$0xff]  ;;  %v256_v39 = vld [vmem:[%s1354_s14 + $0x88] sm:$0xff]  ;;  %v257_v40 = vld [vmem:[%s1354_s14 + $0x90] sm:$0xff] }
  0x1e   : > { %v349_v23 = vmax.f32 %v317_v16, 0.0  ;;  %v350_v24 = vmax.f32 %v318_v17, 0.0  ;;  %v351_v25 = vmax.f32 %v319_v18, 0.0  ;;  %v323_v31 = vadd.f32 %v1359_v2, %v284_v21  ;;  %v251_v42 = vld [vmem:[%s1354_s14 + $0x60] sm:$0xff]  ;;  %v258_v43 = vld [vmem:[%s1354_s14 + $0x98] sm:$0xff]  ;;  %v260_v53 = vld [vmem:[%s1354_s14 + $0xa8] sm:$0xff] }
  0x1f   : > { %v352_v30 = vmax.f32 %v320_v20, 0.0  ;;  %v324_v32 = vadd.f32 %v1359_v2, %v285_v22  ;;  %v286_v33 = vmul.f32 %v1347_v1, %v247_v27  ;;  %v353_v35 = vmax.f32 %v321_v26, 0.0  ;;  %v259_v44 = vld [vmem:[%s1354_s14 + $0xa0] sm:$0xff]  ;;  %v261_v54 = vld [vmem:[%s1354_s14 + $0xb0] sm:$0xff]  ;;  %v252_v0 = vld [vmem:[%s1354_s14 + $0x68] sm:$0xff] }
  0x20   : > { %1105 = vmatprep.mubr.msk.f32.mxu0 %vm382_vm1, %v349_v23  ;;  %v287_v37 = vmul.f32 %v1347_v1, %v248_v29  ;;  %v288_v41 = vmul.f32 %v1347_v1, %v249_v34  ;;  %v354_v45 = vmax.f32 %v322_v28, 0.0  ;;  %v355_v46 = vmax.f32 %v323_v31, 0.0  ;;  %v253_v3 = vld [vmem:[%s1354_s14 + $0x70] sm:$0xff]  ;;  %v262_v11 = vld [vmem:[%s1354_s14 + $0xb8] sm:$0xff]  ;;  %v263_v12 = vld [vmem:[%s1354_s14 + $0xc0] sm:$0xff] }
  0x21   : > { %1106 = vmatmul.mubr.msk.f32.vlgmr.msra.gmra.mrb[0].mxu0 %vm382_vm1, %v350_v24  ;;  %v356_v47 = vmax.f32 %v324_v32, 0.0  ;;  %v325_v48 = vadd.f32 %v1359_v2, %v286_v33  ;;  %v289_v49 = vmul.f32 %v1347_v1, %v250_v36  ;;  %v294_v50 = vmul.f32 %v1347_v1, %v255_v38  ;;  %v254_v18 = vld [vmem:[%s1354_s14 + $0x78] sm:$0xff]  ;;  %v264_v26 = vld [vmem:[%s1354_s14 + $0xc8] sm:$0xff]  ;;  %v265_v27 = vld [vmem:[%s1354_s14 + $0xd0] sm:$0xff] }
  0x22   : > { %1108 = vmatprep.mubr.msk.f32.mxu0 %vm382_vm1, %v351_v25  ;;  %v295_v51 = vmul.f32 %v1347_v1, %v256_v39  ;;  %v296_v52 = vmul.f32 %v1347_v1, %v257_v40  ;;  %v326_v55 = vadd.f32 %v1359_v2, %v287_v37  ;;  %v290_v56 = vmul.f32 %v1347_v1, %v251_v42  ;;  %v266_v39 = vld [vmem:[%s1354_s14 + $0xd8] sm:$0xff]  ;;  %v267_v40 = vld [vmem:[%s1354_s14 + $0xe0] sm:$0xff] }
  0x23   : > { %v297_v57 = vmul.f32 %v1347_v1, %v258_v43  ;;  %v298_v58 = vmul.f32 %v1347_v1, %v259_v44  ;;  %v327_v59 = vadd.f32 %v1359_v2, %v288_v41  ;;  %v333_v60 = vadd.f32 %v1359_v2, %v294_v50  ;;  %v268_v50 = vld [vmem:[%s1354_s14 + $0xe8] sm:$0xff] }
  0x24   : > { %v334_v61 = vadd.f32 %v1359_v2, %v295_v51  ;;  %v335_v62 = vadd.f32 %v1359_v2, %v296_v52  ;;  %v357_v63 = vmax.f32 %v325_v48, 0.0  ;;  %v299_v5 = vmul.f32 %v1347_v1, %v260_v53  ;;  %v269_v51 = vld [vmem:[%s1354_s14 + $0xf0] sm:$0xff] }
  0x25   : > { %1109 = vmatmul.mubr.msk.f32.gmra.mrb[2].mxu0 %vm382_vm1, %v352_v30  ;;  %v336_v4 = vadd.f32 %v1359_v2, %v297_v57  ;;  %v300_v6 = vmul.f32 %v1347_v1, %v261_v54  ;;  %v365_v7 = vmax.f32 %v333_v60, 0.0  ;;  %v337_v10 = vadd.f32 %v1359_v2, %v298_v58 }
  0x26   : > { %1111 = vmatprep.mubr.msk.f32.mxu0 %vm382_vm1, %v353_v35  ;;  %v366_v8 = vmax.f32 %v334_v61, 0.0  ;;  %v367_v9 = vmax.f32 %v335_v62, 0.0  ;;  %v328_v13 = vadd.f32 %v1359_v2, %v289_v49  ;;  %v329_v14 = vadd.f32 %v1359_v2, %v290_v56 }
  0x27   : > { %v291_v15 = vmul.f32 %v1347_v1, %v252_v0  ;;  %v292_v16 = vmul.f32 %v1347_v1, %v253_v3  ;;  %1129 = vmatprep.mubr.msk.f32.mxu1 %vm382_vm1, %v365_v7  ;;  %v358_v17 = vmax.f32 %v326_v55, 0.0  ;;  %v368_v19 = vmax.f32 %v336_v4, 0.0 }
  0x28   : > { %1130 = vmatmul.mubr.msk.f32.vlgmr.msra.gmra.mrb[0].mxu1 %vm382_vm1, %v366_v8  ;;  %v338_v20 = vadd.f32 %v1359_v2, %v299_v5  ;;  %v301_v21 = vmul.f32 %v1347_v1, %v262_v11  ;;  %v359_v22 = vmax.f32 %v327_v59, 0.0  ;;  %v369_v23 = vmax.f32 %v337_v10, 0.0  ;;  %v270_v59 = vld [vmem:[%s1354_s14 + $0xf8] sm:$0xff]  ;;  %s1198_s14 = sshll.u32 %s1258_s13, 4  ;;  %s1199_s14 = int_to_ptr.vmem [resolvable:$false] %s1198_s14 }
  0x29   : > { %1112 = vmatmul.mubr.msk.f32.gmra.mrb[4].mxu0 %vm382_vm1, %v354_v45  ;;  %1132 = vmatprep.mubr.msk.f32.mxu1 %vm382_vm1, %v367_v9  ;;  %v339_v24 = vadd.f32 %v1359_v2, %v300_v6  ;;  %v302_v25 = vmul.f32 %v1347_v1, %v263_v12  ;;  %v330_v28 = vadd.f32 %v1359_v2, %v291_v15  ;;  %v360_v31 = vmax.f32 %v328_v13, 0.0  ;;  %s1200_s15 = scalar_lea.vmem %s1199_s14, 64  ;;  %p1201_p0 = scmp.lt.s32.totalorder %s1703_s6, %s1199_s14 }
  0x2a   : > { %1114 = vmatprep.mubr.msk.f32.mxu0 %vm382_vm1, %v355_v46  ;;  %v331_v29 = vadd.f32 %v1359_v2, %v292_v16  ;;  %v293_v30 = vmul.f32 %v1347_v1, %v254_v18  ;;  %v370_v32 = vmax.f32 %v338_v20, 0.0  ;;  %v340_v33 = vadd.f32 %v1359_v2, %v301_v21  ;;  %p1202_p1 = scmp.lt.s32.totalorder %s1200_s15, %s1194_s12 }
  0x2b   : > { %v303_v34 = vmul.f32 %v1347_v1, %v264_v26  ;;  %v361_v35 = vmax.f32 %v329_v14, 0.0  ;;  %v371_v36 = vmax.f32 %v339_v24, 0.0  ;;  %v341_v37 = vadd.f32 %v1359_v2, %v302_v25 }
  0x2c   : > { %1133 = vmatmul.mubr.msk.f32.gmra.mrb[2].mxu1 %vm382_vm1, %v368_v19  ;;  %v304_v38 = vmul.f32 %v1347_v1, %v265_v27  ;;  %v362_v41 = vmax.f32 %v330_v28, 0.0  ;;  %v332_v42 = vadd.f32 %v1359_v2, %v293_v30  ;;  %v372_v43 = vmax.f32 %v340_v33, 0.0  ;;  %p1203_p2 = por %p1202_p1, %p1201_p0 }
  0x2d   : > { %1115 = vmatmul.mubr.msk.f32.gmra.mrb[6].mxu0 %vm382_vm1, %v356_v47  ;;  %1135 = vmatprep.mubr.msk.f32.mxu1 %vm382_vm1, %v369_v23  ;;  %v342_v44 = vadd.f32 %v1359_v2, %v303_v34  ;;  %v305_v45 = vmul.f32 %v1347_v1, %v266_v39  ;;  %v363_v46 = vmax.f32 %v331_v29, 0.0  ;;  %v373_v47 = vmax.f32 %v341_v37, 0.0 }
  0x2e   : > { %1117 = vmatprep.mubr.msk.f32.mxu0 %vm382_vm1, %v357_v63  ;;  %v343_v48 = vadd.f32 %v1359_v2, %v304_v38  ;;  %v306_v49 = vmul.f32 %v1347_v1, %v267_v40  ;;  %v364_v52 = vmax.f32 %v332_v42, 0.0  ;;  %v307_v55 = vmul.f32 %v1347_v1, %v268_v50  ;;  %p1204_p3 = pnand %p1203_p2, %p1197_p13 }
  0x2f   : > { %v374_v53 = vmax.f32 %v342_v44, 0.0  ;;  %v344_v54 = vadd.f32 %v1359_v2, %v305_v45  ;;  %v308_v58 = vmul.f32 %v1347_v1, %v269_v51  ;;  %v309_v62 = vmul.f32 %v1347_v1, %v270_v59 }
  0x30   : > { %1136 = vmatmul.mubr.msk.f32.gmra.mrb[4].mxu1 %vm382_vm1, %v370_v32  ;;  %v375_v56 = vmax.f32 %v343_v48, 0.0  ;;  %v345_v57 = vadd.f32 %v1359_v2, %v306_v49  ;;  %v346_v61 = vadd.f32 %v1359_v2, %v307_v55 }
  0x31   : > { %1118 = vmatmul.mubr.msk.f32.gmra.mrb[8].mxu0 %vm382_vm1, %v358_v17  ;;  %1138 = vmatprep.mubr.msk.f32.mxu1 %vm382_vm1, %v371_v36  ;;  %v376_v60 = vmax.f32 %v344_v54, 0.0  ;;  %v347_v0 = vadd.f32 %v1359_v2, %v308_v58  ;;  %v348_v4 = vadd.f32 %v1359_v2, %v309_v62 }
  0x32   : > { %1120 = vmatprep.mubr.msk.f32.mxu0 %vm382_vm1, %v359_v22  ;;  %v377_v63 = vmax.f32 %v345_v57, 0.0  ;;  %v378_v3 = vmax.f32 %v346_v61, 0.0 }
  0x33   : > { %v379_v5 = vmax.f32 %v347_v0, 0.0  ;;  %v380_v6 = vmax.f32 %v348_v4, 0.0 }
  0x34   : > { %1139 = vmatmul.mubr.msk.f32.gmra.mrb[6].mxu1 %vm382_vm1, %v372_v43 }
  0x35   : > { %1121 = vmatmul.mubr.msk.f32.gmra.mrb[10].mxu0 %vm382_vm1, %v360_v31  ;;  %1141 = vmatprep.mubr.msk.f32.mxu1 %vm382_vm1, %v373_v47 }
  0x36   : > { %1123 = vmatprep.mubr.msk.f32.mxu0 %vm382_vm1, %v361_v35 }
  0x38   : > { %1142 = vmatmul.mubr.msk.f32.gmra.mrb[8].mxu1 %vm382_vm1, %v374_v53 }
  0x39   : > { %1124 = vmatmul.mubr.msk.f32.gmra.mrb[12].mxu0 %vm382_vm1, %v362_v41  ;;  %1144 = vmatprep.mubr.msk.f32.mxu1 %vm382_vm1, %v375_v56 }
  0x3a   : > { %1126 = vmatprep.mubr.msk.f32.mxu0 %vm382_vm1, %v363_v46 }
  0x3c   : > { %1145 = vmatmul.mubr.msk.f32.gmra.mrb[10].mxu1 %vm382_vm1, %v376_v60 }
  0x3d   : > { %1127 = vmatmul.mubr.msk.f32.gmra.mrb[14].mxu0 %vm382_vm1, %v364_v52  ;;  %1147 = vmatprep.mubr.msk.f32.mxu1 %vm382_vm1, %v377_v63 }
  0x40   : > { %1148 = vmatmul.mubr.msk.f32.gmra.mrb[12].mxu1 %vm382_vm1, %v378_v3 }
  0x41   : > { %1150 = vmatprep.mubr.msk.f32.mxu1 %vm382_vm1, %v379_v5 }
  0x44   : > { %1151 = vmatmul.mubr.msk.f32.gmra.mrb[14].mxu1 %vm382_vm1, %v380_v6 }
  0xf4   : > { %v1107_v1 = vpop.f32.mrb[0].mxu0 }
  0xf5   : > { %710 = vst.msk [vmem:[%s1494_s23 + $0x8] sm:$0xff] %vm708_vm2, %v1107_v1  ;;  %v742_v2 = vsel %vm708_vm2, %v1107_v1, 0.0  ;;  %v811_v7 = vmul.f32 %v1107_v1, %v1107_v1  ;;  %v549_v8 = vpop.f32.mrb[1].mxu0 }
  0xf6   : > { %709 = vst.msk [vmem:[%s1494_s23] sm:$0xff] %vm708_vm2, %v549_v8  ;;  %v741_v9 = vsel %vm708_vm2, %v549_v8, 0.0  ;;  %v810_v10 = vmul.f32 %v549_v8, %v549_v8 }
  0xf7   : > { %v843_v11 = vsel %vm708_vm2, %v811_v7, 0.0  ;;  %v743_v12 = vadd.f32 %v742_v2, %v741_v9 }
  0xf8   : > { %v842_v13 = vsel %vm708_vm2, %v810_v10, 0.0  ;;  %v1110_v14 = vpop.f32.mrb[2].mxu0 }
  0xf9   : > { %v844_v15 = vadd.f32 %v843_v11, %v842_v13  ;;  %712 = vst.msk [vmem:[%s1494_s23 + $0x18] sm:$0xff] %vm708_vm2, %v1110_v14  ;;  %v559_v16 = vpop.f32.mrb[3].mxu0  ;;  %v813_v17 = vmul.f32 %v1110_v14, %v1110_v14  ;;  %v746_v21 = vsel %vm708_vm2, %v1110_v14, 0.0 }
  0xfa   : > { %711 = vst.msk [vmem:[%s1494_s23 + $0x10] sm:$0xff] %vm708_vm2, %v559_v16  ;;  %v744_v18 = vsel %vm708_vm2, %v559_v16, 0.0  ;;  %v812_v19 = vmul.f32 %v559_v16, %v559_v16 }
  0xfb   : > { %v745_v20 = vadd.f32 %v744_v18, %v743_v12  ;;  %v847_v27 = vsel %vm708_vm2, %v813_v17, 0.0  ;;  %v1519_v36 = vpop.f32.mrb[0].mxu1 }
  0xfc   : > { %v845_v22 = vsel %vm708_vm2, %v812_v19, 0.0  ;;  %v1113_v23 = vpop.f32.mrb[4].mxu0  ;;  %726 = vst.msk [vmem:[%s1494_s23 + $0x88] sm:$0xff] %vm708_vm2, %v1519_v36  ;;  %v1526_v40 = vpop.f32.mrb[1].mxu1 }
  0xfd   : > { %v846_v24 = vadd.f32 %v845_v22, %v844_v15  ;;  %714 = vst.msk [vmem:[%s1494_s23 + $0x28] sm:$0xff] %vm708_vm2, %v1113_v23  ;;  %v569_v25 = vpop.f32.mrb[5].mxu0  ;;  %v747_v26 = vadd.f32 %v746_v21, %v745_v20  ;;  %v815_v28 = vmul.f32 %v1113_v23, %v1113_v23  ;;  %v750_v33 = vsel %vm708_vm2, %v1113_v23, 0.0  ;;  %725 = vst.msk [vmem:[%s1494_s23 + $0x80] sm:$0xff] %vm708_vm2, %v1526_v40 }
  0xfe   : > { %713 = vst.msk [vmem:[%s1494_s23 + $0x20] sm:$0xff] %vm708_vm2, %v569_v25  ;;  %v748_v29 = vsel %vm708_vm2, %v569_v25, 0.0  ;;  %v814_v30 = vmul.f32 %v569_v25, %v569_v25 }
  0xff   : > { %v749_v31 = vadd.f32 %v748_v29, %v747_v26  ;;  %v848_v32 = vadd.f32 %v847_v27, %v846_v24  ;;  %v851_v41 = vsel %vm708_vm2, %v815_v28, 0.0  ;;  %v1537_v50 = vpop.f32.mrb[2].mxu1 }
 0x100   : > { %v849_v34 = vsel %vm708_vm2, %v814_v30, 0.0  ;;  %v1116_v35 = vpop.f32.mrb[6].mxu0  ;;  %728 = vst.msk [vmem:[%s1494_s23 + $0x98] sm:$0xff] %vm708_vm2, %v1537_v50  ;;  %v1544_v54 = vpop.f32.mrb[3].mxu1 }
 0x101   : > { %v850_v37 = vadd.f32 %v849_v34, %v848_v32  ;;  %716 = vst.msk [vmem:[%s1494_s23 + $0x38] sm:$0xff] %vm708_vm2, %v1116_v35  ;;  %v579_v38 = vpop.f32.mrb[7].mxu0  ;;  %v751_v39 = vadd.f32 %v750_v33, %v749_v31  ;;  %v817_v42 = vmul.f32 %v1116_v35, %v1116_v35  ;;  %v754_v47 = vsel %vm708_vm2, %v1116_v35, 0.0  ;;  %727 = vst.msk [vmem:[%s1494_s23 + $0x90] sm:$0xff] %vm708_vm2, %v1544_v54 }
 0x102   : > { %715 = vst.msk [vmem:[%s1494_s23 + $0x30] sm:$0xff] %vm708_vm2, %v579_v38  ;;  %v752_v43 = vsel %vm708_vm2, %v579_v38, 0.0  ;;  %v816_v44 = vmul.f32 %v579_v38, %v579_v38  ;;  %v826_v32 = vmul.f32 %v1526_v40, %v1526_v40 }
 0x103   : > { %v753_v45 = vadd.f32 %v752_v43, %v751_v39  ;;  %v852_v46 = vadd.f32 %v851_v41, %v850_v37  ;;  %v855_v55 = vsel %vm708_vm2, %v817_v42, 0.0  ;;  %v1555_v0 = vpop.f32.mrb[4].mxu1 }
 0x104   : > { %v853_v48 = vsel %vm708_vm2, %v816_v44, 0.0  ;;  %v1119_v49 = vpop.f32.mrb[8].mxu0  ;;  %730 = vst.msk [vmem:[%s1494_s23 + $0xa8] sm:$0xff] %vm708_vm2, %v1555_v0  ;;  %v1562_v6 = vpop.f32.mrb[5].mxu1  ;;  %v772_v44 = vsel %vm708_vm2, %v1526_v40, 0.0  ;;  %v828_v40 = vmul.f32 %v1544_v54, %v1544_v54 }
 0x105   : > { %v854_v51 = vadd.f32 %v853_v48, %v852_v46  ;;  %718 = vst.msk [vmem:[%s1494_s23 + $0x48] sm:$0xff] %vm708_vm2, %v1119_v49  ;;  %v589_v52 = vpop.f32.mrb[9].mxu0  ;;  %v755_v53 = vadd.f32 %v754_v47, %v753_v45  ;;  %v819_v56 = vmul.f32 %v1119_v49, %v1119_v49  ;;  %v758_v61 = vsel %vm708_vm2, %v1119_v49, 0.0  ;;  %729 = vst.msk [vmem:[%s1494_s23 + $0xa0] sm:$0xff] %vm708_vm2, %v1562_v6 }
 0x106   : > { %717 = vst.msk [vmem:[%s1494_s23 + $0x40] sm:$0xff] %vm708_vm2, %v589_v52  ;;  %v756_v57 = vsel %vm708_vm2, %v589_v52, 0.0  ;;  %v818_v58 = vmul.f32 %v589_v52, %v589_v52  ;;  %v873_v52 = vsel %vm708_vm2, %v826_v32, 0.0 }
 0x107   : > { %v757_v59 = vadd.f32 %v756_v57, %v755_v53  ;;  %v856_v60 = vadd.f32 %v855_v55, %v854_v51  ;;  %v859_v1 = vsel %vm708_vm2, %v819_v56, 0.0  ;;  %v1573_v14 = vpop.f32.mrb[6].mxu1  ;;  %v827_v51 = vmul.f32 %v1519_v36, %v1519_v36 }
 0x108   : > { %v857_v62 = vsel %vm708_vm2, %v818_v58, 0.0  ;;  %v1122_v63 = vpop.f32.mrb[10].mxu0  ;;  %732 = vst.msk [vmem:[%s1494_s23 + $0xb8] sm:$0xff] %vm708_vm2, %v1573_v14  ;;  %v1580_v18 = vpop.f32.mrb[7].mxu1  ;;  %v774_v56 = vsel %vm708_vm2, %v1519_v36, 0.0  ;;  %v776_v57 = vsel %vm708_vm2, %v1544_v54, 0.0  ;;  %v830_v36 = vmul.f32 %v1562_v6, %v1562_v6 }
 0x109   : > { %v858_v3 = vadd.f32 %v857_v62, %v856_v60  ;;  %720 = vst.msk [vmem:[%s1494_s23 + $0x58] sm:$0xff] %vm708_vm2, %v1122_v63  ;;  %v599_v4 = vpop.f32.mrb[11].mxu0  ;;  %v759_v5 = vadd.f32 %v758_v61, %v757_v59  ;;  %v821_v2 = vmul.f32 %v1122_v63, %v1122_v63  ;;  %v762_v11 = vsel %vm708_vm2, %v1122_v63, 0.0  ;;  %731 = vst.msk [vmem:[%s1494_s23 + $0xb0] sm:$0xff] %vm708_vm2, %v1580_v18 }
 0x10a   : > { %719 = vst.msk [vmem:[%s1494_s23 + $0x50] sm:$0xff] %vm708_vm2, %v599_v4  ;;  %v760_v7 = vsel %vm708_vm2, %v599_v4, 0.0  ;;  %v820_v8 = vmul.f32 %v599_v4, %v599_v4  ;;  %v875_v62 = vsel %vm708_vm2, %v827_v51, 0.0  ;;  %v829_v63 = vmul.f32 %v1537_v50, %v1537_v50 }
 0x10b   : > { %v761_v9 = vadd.f32 %v760_v7, %v759_v5  ;;  %v860_v10 = vadd.f32 %v859_v1, %v858_v3  ;;  %v863_v19 = vsel %vm708_vm2, %v821_v2, 0.0  ;;  %v1591_v28 = vpop.f32.mrb[8].mxu1  ;;  %v877_v3 = vsel %vm708_vm2, %v828_v40, 0.0 }
 0x10c   : > { %v861_v12 = vsel %vm708_vm2, %v820_v8, 0.0  ;;  %v1125_v13 = vpop.f32.mrb[12].mxu0  ;;  %734 = vst.msk [vmem:[%s1494_s23 + $0xc8] sm:$0xff] %vm708_vm2, %v1591_v28  ;;  %v1600_v33 = vpop.f32.mrb[9].mxu1  ;;  %v778_v5 = vsel %vm708_vm2, %v1537_v50, 0.0  ;;  %v780_v1 = vsel %vm708_vm2, %v1562_v6, 0.0  ;;  %v832_v50 = vmul.f32 %v1580_v18, %v1580_v18 }
 0x10d   : > { %v862_v15 = vadd.f32 %v861_v12, %v860_v10  ;;  %722 = vst.msk [vmem:[%s1494_s23 + $0x68] sm:$0xff] %vm708_vm2, %v1125_v13  ;;  %v609_v16 = vpop.f32.mrb[13].mxu0  ;;  %v763_v17 = vadd.f32 %v762_v11, %v761_v9  ;;  %v823_v20 = vmul.f32 %v1125_v13, %v1125_v13  ;;  %v766_v25 = vsel %vm708_vm2, %v1125_v13, 0.0  ;;  %733 = vst.msk [vmem:[%s1494_s23 + $0xc0] sm:$0xff] %vm708_vm2, %v1600_v33 }
 0x10e   : > { %721 = vst.msk [vmem:[%s1494_s23 + $0x60] sm:$0xff] %vm708_vm2, %v609_v16  ;;  %v764_v21 = vsel %vm708_vm2, %v609_v16, 0.0  ;;  %v822_v22 = vmul.f32 %v609_v16, %v609_v16  ;;  %v879_v12 = vsel %vm708_vm2, %v829_v63, 0.0  ;;  %v831_v13 = vmul.f32 %v1555_v0, %v1555_v0 }
 0x10f   : > { %v765_v23 = vadd.f32 %v764_v21, %v763_v17  ;;  %v864_v24 = vadd.f32 %v863_v19, %v862_v15  ;;  %v867_v34 = vsel %vm708_vm2, %v823_v20, 0.0  ;;  %v1613_v45 = vpop.f32.mrb[10].mxu1  ;;  %v881_v15 = vsel %vm708_vm2, %v830_v36, 0.0 }
 0x110   : > { %v865_v26 = vsel %vm708_vm2, %v822_v22, 0.0  ;;  %v1128_v27 = vpop.f32.mrb[14].mxu0  ;;  %736 = vst.msk [vmem:[%s1494_s23 + $0xd8] sm:$0xff] %vm708_vm2, %v1613_v45  ;;  %v679_v48 = vpop.f32.mrb[11].mxu1  ;;  %v782_v19 = vsel %vm708_vm2, %v1555_v0, 0.0  ;;  %v784_v20 = vsel %vm708_vm2, %v1580_v18, 0.0 }
 0x111   : > { %v866_v29 = vadd.f32 %v865_v26, %v864_v24  ;;  %724 = vst.msk [vmem:[%s1494_s23 + $0x78] sm:$0xff] %vm708_vm2, %v1128_v27  ;;  %v619_v30 = vpop.f32.mrb[15].mxu0  ;;  %v767_v31 = vadd.f32 %v766_v25, %v765_v23  ;;  %v825_v35 = vmul.f32 %v1128_v27, %v1128_v27  ;;  %v770_v42 = vsel %vm708_vm2, %v1128_v27, 0.0  ;;  %735 = vst.msk [vmem:[%s1494_s23 + $0xd0] sm:$0xff] %vm708_vm2, %v679_v48 }
 0x112   : > { %723 = vst.msk [vmem:[%s1494_s23 + $0x70] sm:$0xff] %vm708_vm2, %v619_v30  ;;  %v768_v37 = vsel %vm708_vm2, %v619_v30, 0.0  ;;  %v824_v38 = vmul.f32 %v619_v30, %v619_v30  ;;  %v883_v23 = vsel %vm708_vm2, %v831_v13, 0.0  ;;  %v833_v24 = vmul.f32 %v1573_v14, %v1573_v14 }
 0x113   : > { %v769_v39 = vadd.f32 %v768_v37, %v767_v31  ;;  %v868_v41 = vadd.f32 %v867_v34, %v866_v29  ;;  %v871_v49 = vsel %vm708_vm2, %v825_v35, 0.0  ;;  %v1630_v58 = vpop.f32.mrb[12].mxu1  ;;  %v885_v25 = vsel %vm708_vm2, %v832_v50, 0.0 }
 0x114   : > { %v869_v43 = vsel %vm708_vm2, %v824_v38, 0.0  ;;  %738 = vst.msk [vmem:[%s1494_s23 + $0xe8] sm:$0xff] %vm708_vm2, %v1630_v58  ;;  %v689_v61 = vpop.f32.mrb[13].mxu1  ;;  %v834_v26 = vmul.f32 %v1600_v33, %v1600_v33  ;;  %v786_v0 = vsel %vm708_vm2, %v1573_v14, 0.0  ;;  %v788_v18 = vsel %vm708_vm2, %v1600_v33, 0.0 }
 0x115   : > { %v771_v46 = vadd.f32 %v770_v42, %v769_v39  ;;  %v870_v47 = vadd.f32 %v869_v43, %v868_v41  ;;  %737 = vst.msk [vmem:[%s1494_s23 + $0xe0] sm:$0xff] %vm708_vm2, %v689_v61  ;;  %v887_v32 = vsel %vm708_vm2, %v833_v24, 0.0  ;;  %v835_v34 = vmul.f32 %v1591_v28, %v1591_v28 }
 0x116   : > { %v889_v35 = vsel %vm708_vm2, %v834_v26, 0.0  ;;  %v836_v37 = vmul.f32 %v679_v48, %v679_v48  ;;  %v790_v41 = vsel %vm708_vm2, %v1591_v28, 0.0  ;;  %v792_v14 = vsel %vm708_vm2, %v679_v48, 0.0 }
 0x117   : > { %v872_v53 = vadd.f32 %v871_v49, %v870_v47  ;;  %v773_v55 = vadd.f32 %v772_v44, %v771_v46  ;;  %v1152_v2 = vpop.f32.mrb[14].mxu1  ;;  %v891_v33 = vsel %vm708_vm2, %v835_v34, 0.0  ;;  %v837_v44 = vmul.f32 %v1613_v45, %v1613_v45 }
 0x118   : > { %740 = vst.msk [vmem:[%s1494_s23 + $0xf8] sm:$0xff] %vm708_vm2, %v1152_v2  ;;  %v802_v9 = vsel %vm708_vm2, %v1152_v2, 0.0  ;;  %v841_v10 = vmul.f32 %v1152_v2, %v1152_v2  ;;  %v699_v11 = vpop.f32.mrb[15].mxu1  ;;  %v893_v46 = vsel %vm708_vm2, %v836_v37, 0.0  ;;  %v838_v47 = vmul.f32 %v689_v61, %v689_v61 }
 0x119   : > { %v874_v59 = vadd.f32 %v873_v52, %v872_v53  ;;  %v775_v60 = vadd.f32 %v774_v56, %v773_v55  ;;  %739 = vst.msk [vmem:[%s1494_s23 + $0xf0] sm:$0xff] %vm708_vm2, %v699_v11  ;;  %v794_v52 = vsel %vm708_vm2, %v1613_v45, 0.0  ;;  %v796_v40 = vsel %vm708_vm2, %v689_v61, 0.0 }
 0x11a   : > { %v903_v17 = vsel %vm708_vm2, %v841_v10, 0.0  ;;  %v895_v48 = vsel %vm708_vm2, %v837_v44, 0.0  ;;  %v839_v55 = vmul.f32 %v1630_v58, %v1630_v58  ;;  %v897_v56 = vsel %vm708_vm2, %v838_v47, 0.0 }
 0x11b   : > { %v777_v54 = vadd.f32 %v776_v57, %v775_v60  ;;  %v876_v4 = vadd.f32 %v875_v62, %v874_v59  ;;  %v840_v57 = vmul.f32 %v699_v11, %v699_v11  ;;  %v798_v62 = vsel %vm708_vm2, %v1630_v58, 0.0 }
 0x11c   : > { %v800_v45 = vsel %vm708_vm2, %v699_v11, 0.0 }
 0x11d   : > { %v878_v7 = vadd.f32 %v877_v3, %v876_v4  ;;  %v779_v8 = vadd.f32 %v778_v5, %v777_v54  ;;  %v899_v3 = vsel %vm708_vm2, %v839_v55, 0.0  ;;  %v901_v36 = vsel %vm708_vm2, %v840_v57, 0.0 }
 0x11f   : > { %v781_v6 = vadd.f32 %v780_v1, %v779_v8  ;;  %v880_v16 = vadd.f32 %v879_v12, %v878_v7 }
 0x121   : > { %v882_v21 = vadd.f32 %v881_v15, %v880_v16  ;;  %v783_v22 = vadd.f32 %v782_v19, %v781_v6 }
 0x123   : > { %v785_v27 = vadd.f32 %v784_v20, %v783_v22  ;;  %v884_v29 = vadd.f32 %v883_v23, %v882_v21 }
 0x125   : > { %v886_v30 = vadd.f32 %v885_v25, %v884_v29  ;;  %v787_v31 = vadd.f32 %v786_v0, %v785_v27 }
 0x127   : > { %v789_v38 = vadd.f32 %v788_v18, %v787_v31  ;;  %v888_v39 = vadd.f32 %v887_v32, %v886_v30 }
 0x129   : > { %v890_v42 = vadd.f32 %v889_v35, %v888_v39  ;;  %v791_v43 = vadd.f32 %v790_v41, %v789_v38 }
 0x12b   : > { %v793_v49 = vadd.f32 %v792_v14, %v791_v43  ;;  %v892_v51 = vadd.f32 %v891_v33, %v890_v42 }
 0x12d   : > { %v894_v28 = vadd.f32 %v893_v46, %v892_v51  ;;  %v795_v53 = vadd.f32 %v794_v52, %v793_v49 }
 0x12f   : > { %v797_v59 = vadd.f32 %v796_v40, %v795_v53  ;;  %v896_v60 = vadd.f32 %v895_v48, %v894_v28 }
 0x131   : > { %v898_v63 = vadd.f32 %v897_v56, %v896_v60  ;;  %v799_v61 = vadd.f32 %v798_v62, %v797_v59 }
 0x133   : > { %v801_v54 = vadd.f32 %v800_v45, %v799_v61  ;;  %v900_v4 = vadd.f32 %v899_v3, %v898_v63 }
 0x135   : > { %v803_v5 = vadd.f32 %v802_v9, %v801_v54  ;;  %v902_v1 = vadd.f32 %v901_v36, %v900_v4 }
 0x137   : > { %v804_v2 = vrot.slane %v803_v5, 4  ;;  %v904_v7 = vadd.f32 %v903_v17, %v902_v1 }
 0x139   : > { %v805_v8 = vadd.f32 %v804_v2, %v803_v5  ;;  %v905_v10 = vrot.slane %v904_v7, 4 }
 0x13b   : > { %v806_v12 = vrot.slane %v805_v8, 2  ;;  %v906_v58 = vadd.f32 %v905_v10, %v904_v7 }
 0x13d   : > { %v807_v11 = vadd.f32 %v806_v12, %v805_v8  ;;  %v907_v13 = vrot.slane %v906_v58, 2 }
 0x13f   : > { %v808_v15 = vrot.slane %v807_v11, 1  ;;  %v908_v50 = vadd.f32 %v907_v13, %v906_v58 }
 0x141   : > { %v909_v6 = vrot.slane %v908_v50, 1  ;;  %v809_v9 = vadd.f32 %v808_v15, %v807_v11 }
 0x143   : > { %v910_v16 = vadd.f32 %v909_v6, %v908_v50 }
 0x145   : > { %v912_v17 = vsel %vm911_vm3, %v809_v9, %v910_v16 }
 0x146   : > { %914 = vst.msk [vmem:[%s226_s30] sm:$0x3] %vm913_vm4, %v912_v17 }
 0x147   : > { %1207 = shalt.err (!%p1204_p3)
}
 0x148   : > { %s1208_s7 = scalar_lea.hbm %s1701_s10, 32  ;;  %s1212_s22 = scalar_lea.hbm %s1748_s5, 64 }
 0x149   : > { %p1209_p4 = scmp.ne.s32.totalorder %s1701_s10, %s1208_s7  ;;  %p1213_p9 = scmp.lt.u32.totalorder %s1701_s10, %s1748_s5 }
 0x14a   : > { %p1214_p10 = scmp.lt.u32.totalorder %s1212_s22, %s1208_s7  ;;  %p1216_p12 = scmp.lt.u32.totalorder %s1208_s7, %s1701_s10 }
 0x14b   : > { %p1210_p7 = pnand %p1209_p4, %p1324_p5 }
 0x14c   : > { %p1215_p11 = por %p1214_p10, %p1213_p9 }
 0x14d   : > { %p1211_p8 = pneg %p1210_p7 }
 0x14e   : > { %p1217_p13 = por %p1216_p12, %p1215_p11 }
 0x150   : > { %p1218_p0 = pnand %p1217_p13, %p1211_p8 }
 0x152   : > { %1221 = shalt.err (!%p1218_p0)
}
 0x153   : > { %1155 = dma.vmem_to_hbm [thread:$0]  (%p1324_p5), %s1703_s6, 32, %s1701_s10, %s921_s11  }
 0x154 PF: > { %p1161_p1 = scmp.ge.s32.totalorder %s1256_s21, 2  ;;  %s958_s26 = sand.u32 1, %s1244_s18  }
 0x155   : > { %s959_s30 = scalar_lea.sflag [#allocation3], %s958_s26 }
 0x156   : > { %p1158_p2 = pnand %p1161_p1, %p1328_p6 }
 0x158   : > { %1239 = dma.done.wait (!%p1158_p2), %s959_s30, 32  }
 0x159   : > { %1241 = vsyncadd (!%p1158_p2), %s959_s30, 4294967264  ;;  %p16_p3 = scmp.ge.s32.totalorder %s1312_s24, 4   ;;  %s1751_s18 = smov %s1248_s19 }
 0x15a   : > { %s1752_s19 = smov %s1252_s20  ;;  %s1753_s20 = smov %s1322_s27 }
 0x15b   : > { %s1754_s21 = smov %s1312_s24  ;;  %18 = sbr.rel (!%p16_p3) target bundleno = 3 (0x3), region = 83 }
 0x162   :  { %964 = vsyncpa [#allocation3], 1 }
 0x163   :  { %966 = vsyncpa [#allocation3 + $0x1], 1 }

</bundles_post_ra>
